<compile_context>
chip_gen: v7x
topology: tpu7x:2x2x1
jax: 0.10.0
libtpu: 0.0.40
codegen_flags: <defaults>
</compile_context>

<pallas_src>
import functools

import jax
import jax.numpy as jnp
from jax.experimental import pallas as pl
from jax.experimental.pallas import tpu as pltpu


class Partition:
    """Minimal stand-in for the torch `partition` object (only .rank is used)."""

    def __init__(self, rank: int):
        self.rank = rank


# Inputs smaller than this never launch a kernel: fixed launch / DMA-descriptor
# cost (microseconds) dwarfs the sub-microsecond copy time.
_SMALL_BYPASS_BYTES = 1 << 20       # 1 MiB

# Target bytes per DMA chunk.  4 MiB keeps per-DMA issue overhead well under
# 10% of the transfer time even at v7x's 3.2 TB/s HBM (and is comfortably large
# for v6e/v5e as well).
_TARGET_CHUNK_BYTES = 4 << 20       # 4 MiB
_MAX_CHUNKS = 8                     # also bounds the DMA-semaphore array size


def _make_chunks(leading, total_bytes, target_chunk_bytes):
    """Static (start_row, num_rows) chunks along the leading dim (ragged last)."""
    if leading <= 1 or total_bytes <= target_chunk_bytes:
        return [(0, leading)]
    num_chunks = min(
        _MAX_CHUNKS,
        -(-total_bytes // target_chunk_bytes),   # ceil-div
        leading,
    )
    rows = -(-leading // num_chunks)             # ceil-div
    chunks = []
    start = 0
    while start < leading:
        size = min(rows, leading - start)
        chunks.append((start, size))
        start += size
    return chunks


def _dma_clone_kernel(x_hbm, o_hbm, sems, *, chunks):
    """Direct HBM->HBM clone.

    Issues every chunk DMA (each with its own semaphore slot) before waiting on
    any of them, so all chunks are in flight concurrently — no start();wait()
    serialization, no exposed per-chunk issue latency.
    """
    copies = []
    for idx, (start, size) in enumerate(chunks):
        cp = pltpu.make_async_copy(
            x_hbm.at[pl.ds(start, size)],
            o_hbm.at[pl.ds(start, size)],
            sems.at[idx],
        )
        cp.start()
        copies.append(cp)
    for cp in copies:
        cp.wait()


def _pallas_clone(x: jax.Array, *, target_chunk_bytes=_TARGET_CHUNK_BYTES) -> jax.Array:
    """Bit-exact clone of `x` via bulk HBM->HBM DMA (x.ndim >= 1 assumed)."""
    total_bytes = x.size * x.dtype.itemsize
    chunks = _make_chunks(x.shape[0], total_bytes, target_chunk_bytes)
    num_chunks = len(chunks)

    kernel = functools.partial(_dma_clone_kernel, chunks=chunks)

    return pl.pallas_call(
        kernel,
        out_shape=jax.ShapeDtypeStruct(x.shape, x.dtype),
        # Raw HBM refs on both sides: no auto-DMA, no VMEM staging, no (8,128)
        # tiling constraints — the copy is purely DMA / HBM-bandwidth bound.
        in_specs=[pl.BlockSpec(memory_space=pl.ANY)],
        out_specs=pl.BlockSpec(memory_space=pl.ANY),
        scratch_shapes=[pltpu.SemaphoreType.DMA((num_chunks,))],
        cost_estimate=pl.CostEstimate(
            flops=0,
            transcendentals=0,
            bytes_accessed=2 * total_bytes,
        ),
    )(x)


def distributed_network_output(x: jax.Array, partition: Partition) -> jax.Array:
    """Forward pass of DistributedNetworkOutput.

    rank == 0 : clone of `x` (identity; bulk DMA kernel only for large inputs).
    rank != 0 : float32 [0.0], matching torch.tensor([0.0]).float().
    """
    if partition.rank != 0:
        return jnp.zeros((1,), dtype=jnp.float32)

    total_bytes = x.size * x.dtype.itemsize
    if x.ndim == 0 or total_bytes < _SMALL_BYPASS_BYTES:
        # JAX arrays are immutable, so a clone is semantically a no-op; skipping
        # the kernel avoids launch overhead that dwarfs the copy for tiny tensors.
        return x
    return _pallas_clone(x)


if __name__ == "__main__":
    key = jax.random.PRNGKey(0)
    part0 = Partition(rank=0)
    part1 = Partition(rank=1)

    # 1) Module-shaped small input (2,4,16,16) f32 = 8 KiB -> fast path (no kernel).
    x = jax.random.normal(key, (2, 4, 16, 16), dtype=jnp.float32)
    y0 = jax.block_until_ready(distributed_network_output(x, part0))
    assert y0.shape == x.shape and y0.dtype == x.dtype
    assert bool(jnp.all(y0 == x))

    # 2) 2 MiB input -> Pallas clone, single whole-array DMA (default chunk target).
    x_mid = jax.random.normal(jax.random.PRNGKey(0), (4, 32, 64, 64), dtype=jnp.float32)
    y_mid = jax.block_until_ready(distributed_network_output(x_mid, part0))
    assert y_mid.shape == x_mid.shape and y_mid.dtype == x_mid.dtype
    assert bool(jnp.all(y_mid == x_mid))

    # 3) 2.5 MiB input with a small chunk target -> exercises the multi-DMA path
    #    with concurrent in-flight copies and a ragged last chunk (batch=5).
    x_big = jax.random.normal(jax.random.PRNGKey(0), (5, 32, 64, 64), dtype=jnp.float32)
    y_big = jax.block_until_ready(_pallas_clone(x_big, target_chunk_bytes=1 << 20))
    assert y_big.shape == x_big.shape and y_big.dtype == x_big.dtype
    assert bool(jnp.all(y_big == x_big))

    # 4) rank != 0: returns float32 [0.0].
    y1 = jax.block_until_ready(distributed_network_output(x, part1))
    assert y1.shape == (1,) and y1.dtype == jnp.float32
    assert float(y1[0]) == 0.0

    print("KERNEL_OK")
</pallas_src>

<mosaic_0001>
module attributes {stable_mosaic.version = 11 : i64} {
  func.func @_dma_clone_kernel(%arg0: memref<4x32x64x64xf32, #tpu.memory_space<any>>, %arg1: memref<4x32x64x64xf32, #tpu.memory_space<any>>, %arg2: memref<1x!tpu.dma_semaphore, #tpu.memory_space<semaphore_mem>>) attributes {dimension_semantics = [], scalar_prefetch = 0 : i64, scratch_operands = 1 : i64, tpu.core_type = #tpu.core_type<tc>} {
    %c0_i32 = arith.constant 0 : i32
    %c0_i32_0 = arith.constant 0 : i32
    %c0_i32_1 = arith.constant 0 : i32
    %c0_i32_2 = arith.constant 0 : i32
    %c0_i32_3 = arith.constant 0 : i32
    %0 = tpu.memref_slice %arg0[%c0_i32_0, %c0_i32_1, %c0_i32_2, %c0_i32_3] : memref<4x32x64x64xf32, #tpu.memory_space<any>> -> memref<4x32x64x64xf32, #tpu.memory_space<any>>
    %c0_i32_4 = arith.constant 0 : i32
    %c0_i32_5 = arith.constant 0 : i32
    %c0_i32_6 = arith.constant 0 : i32
    %c0_i32_7 = arith.constant 0 : i32
    %1 = tpu.memref_slice %arg1[%c0_i32_4, %c0_i32_5, %c0_i32_6, %c0_i32_7] : memref<4x32x64x64xf32, #tpu.memory_space<any>> -> memref<4x32x64x64xf32, #tpu.memory_space<any>>
    %2 = tpu.memref_slice %arg2[%c0_i32] : memref<1x!tpu.dma_semaphore, #tpu.memory_space<semaphore_mem>> -> memref<1x!tpu.dma_semaphore, #tpu.memory_space<semaphore_mem>>
    %3 = tpu.memref_squeeze %2 : memref<1x!tpu.dma_semaphore, #tpu.memory_space<semaphore_mem>> -> memref<!tpu.dma_semaphore, #tpu.memory_space<semaphore_mem>>
    tpu.enqueue_dma source(%0 : memref<4x32x64x64xf32, #tpu.memory_space<any>>) target(%1 : memref<4x32x64x64xf32, #tpu.memory_space<any>>) target_semaphore(%3 : memref<!tpu.dma_semaphore, #tpu.memory_space<semaphore_mem>>)
    %c0_i32_8 = arith.constant 0 : i32
    %c0_i32_9 = arith.constant 0 : i32
    %c0_i32_10 = arith.constant 0 : i32
    %c0_i32_11 = arith.constant 0 : i32
    %c0_i32_12 = arith.constant 0 : i32
    %4 = tpu.memref_slice %arg0[%c0_i32_9, %c0_i32_10, %c0_i32_11, %c0_i32_12] : memref<4x32x64x64xf32, #tpu.memory_space<any>> -> memref<4x32x64x64xf32, #tpu.memory_space<any>>
    %c0_i32_13 = arith.constant 0 : i32
    %c0_i32_14 = arith.constant 0 : i32
    %c0_i32_15 = arith.constant 0 : i32
    %c0_i32_16 = arith.constant 0 : i32
    %5 = tpu.memref_slice %arg1[%c0_i32_13, %c0_i32_14, %c0_i32_15, %c0_i32_16] : memref<4x32x64x64xf32, #tpu.memory_space<any>> -> memref<4x32x64x64xf32, #tpu.memory_space<any>>
    %6 = tpu.memref_slice %arg2[%c0_i32_8] : memref<1x!tpu.dma_semaphore, #tpu.memory_space<semaphore_mem>> -> memref<1x!tpu.dma_semaphore, #tpu.memory_space<semaphore_mem>>
    %7 = tpu.memref_squeeze %6 : memref<1x!tpu.dma_semaphore, #tpu.memory_space<semaphore_mem>> -> memref<!tpu.dma_semaphore, #tpu.memory_space<semaphore_mem>>
    tpu.wait_dma2 semaphore(%7 : memref<!tpu.dma_semaphore, #tpu.memory_space<semaphore_mem>>) src(%4 : memref<4x32x64x64xf32, #tpu.memory_space<any>>) dst(%5 : memref<4x32x64x64xf32, #tpu.memory_space<any>>)
    return
  }
}

</mosaic_0001>

<bundles_post_ra>
// kernel: tpu_custom_call.1
= control target key start
LH: loop header
LB: loop body
LE: loop exit
PB: predicated region body
PF: predicated region fallthrough
CT: control target
= control target key end

     0   :  { %s36_s6 = smov [#allocation2]   ;;  %s37_s7 = smov [#allocation3]   ;;  %s55_s0 = inlined_call_operand.hbm [shape: f32[4,32,64,64], index: 0, kind: input, shape index: {}]   ;;  %s56_s1 = inlined_call_operand.hbm [shape: f32[4,32,64,64], index: 1, kind: output, shape index: {}]  }
   0x1   :  { %s38_s8 = smov 0  }
   0x2   :  { %18 = dma.general %s55_s0, 131072, %s56_s1, %s36_s6, %s37_s7, [#allocation4], %s38_s8, 0  }
   0x3   :  { %34 = dma.done.wait [#allocation2], 131072 }
   0x4   :  { %35 = vsyncadd [#allocation2], 4294836224 }
   0x5   :  { %24 = vsyncmov [#allocation2] }
   0x8   :  { %s25_s13 = vpop.sfrf %24 }
   0x9   :  { %p30_p0 = scmp.ne.s32.totalorder %s25_s13, 0 }
   0xb   :  { %29 = shalt.err (%p30_p0)  }

</bundles_post_ra>
